<compile_context>
chip_gen: v5e
topology: v5e:2x2
jax: 0.10.0
libtpu: 0.0.40
codegen_flags: <defaults>
</compile_context>

<pallas_src>
import functools

import jax
import jax.numpy as jnp
from jax.experimental import pallas as pl
from jax.experimental.pallas import tpu as pltpu

LANE_CANDIDATES = (8192, 4096, 2048, 1024, 512, 256, 128)
TARGET_BLOCK_ELEMS = 512 * 1024  # ~2 MiB per block at f32


def _leaky_relu_kernel(x_ref, o_ref, *, negative_slope):
    x = x_ref[...]
    o_ref[...] = jnp.where(x >= 0, x, x * negative_slope)


def _pick_width(n):
    """Widest lane-dense width (multiple of 128) that divides n, else None."""
    for w in LANE_CANDIDATES:
        if n % w == 0:
            return w
    return None


@functools.partial(jax.jit, static_argnames=("negative_slope",))
def leaky_relu(x, negative_slope: float = 0.01):
    orig_shape = x.shape
    dtype = x.dtype
    flat = x.reshape(-1)
    n = flat.shape[0]

    w = _pick_width(n)
    padded = False
    if w is None:
        # n not a multiple of 128: minimal pad fallback (rare path).
        # TODO(synk): could instead mask the tail in-kernel with pltpu.store.
        w = 128
        n_pad = pl.cdiv(n, w) * w
        flat = jnp.pad(flat, (0, n_pad - n))
        padded = True

    x2d = flat.reshape(-1, w)  # (rows, W) lane-dense slab
    rows = x2d.shape[0]

    # Block rows: ~2 MiB per block; multiple of 8, or the full row extent.
    target_rows = max(TARGET_BLOCK_ELEMS // w, 8)
    if rows <= target_rows:
        block_rows = rows  # whole array in one block (full-dim exception)
    else:
        block_rows = (target_rows // 8) * 8
    grid = (pl.cdiv(rows, block_rows),)

    kernel = functools.partial(_leaky_relu_kernel, negative_slope=negative_slope)

    out2d = pl.pallas_call(
        kernel,
        out_shape=jax.ShapeDtypeStruct((rows, w), dtype),
        grid_spec=pltpu.PrefetchScalarGridSpec(
            num_scalar_prefetch=0,
            grid=grid,
            in_specs=[pl.BlockSpec((block_rows, w), lambda i: (i, 0))],
            out_specs=pl.BlockSpec((block_rows, w), lambda i: (i, 0)),
        ),
        compiler_params=pltpu.CompilerParams(
            dimension_semantics=("parallel",),
        ),
    )(x2d)

    out_flat = out2d.reshape(-1)
    if padded:
        out_flat = out_flat[:n]
    return out_flat.reshape(orig_shape)


if __name__ == "__main__":
    key = jax.random.PRNGKey(0)

    # Small NCHW-like input consistent with "any shape" semantics.
    x = jax.random.normal(key, (2, 4, 16, 16), dtype=jnp.float32)
    y = jax.block_until_ready(leaky_relu(x, negative_slope=0.01))
    ref = jnp.where(x >= 0, x, 0.01 * x)
    assert y.shape == x.shape and y.dtype == x.dtype
    assert jnp.allclose(y, ref, atol=0, rtol=0)

    # Non-128-divisible size exercises the (rare) padded fallback path.
    x2 = jax.random.normal(jax.random.PRNGKey(1), (3, 5, 7), dtype=jnp.float32)
    y2 = jax.block_until_ready(leaky_relu(x2, negative_slope=0.2))
    ref2 = jnp.where(x2 >= 0, x2, 0.2 * x2)
    assert y2.shape == x2.shape
    assert jnp.allclose(y2, ref2, atol=0, rtol=0)

    print("KERNEL_OK")
</pallas_src>

<mosaic_0001>
module attributes {stable_mosaic.version = 11 : i64} {
  func.func @_leaky_relu_kernel(%arg0: i32, %arg1: memref<1x2048xf32, #tpu.memory_space<vmem>>, %arg2: memref<1x2048xf32, #tpu.memory_space<vmem>>) attributes {dimension_semantics = [#tpu.dimension_semantics<parallel>], iteration_bounds = array<i64: 1>, scalar_prefetch = 0 : i64, scratch_operands = 0 : i64, tpu.core_type = #tpu.core_type<tc>, window_params = [{transform_indices = @transform_0, window_bounds = array<i64: 1, 2048>}, {transform_indices = @transform_1, window_bounds = array<i64: 1, 2048>}]} {
    %c0 = arith.constant 0 : index
    %c0_0 = arith.constant 0 : index
    %0 = vector.load %arg1[%c0, %c0_0] : memref<1x2048xf32, #tpu.memory_space<vmem>>, vector<1x2048xf32>
    %cst = arith.constant 0.000000e+00 : f32
    %1 = vector.broadcast %cst : f32 to vector<1x2048xf32>
    %2 = arith.cmpf oge, %0, %1 : vector<1x2048xf32>
    %cst_1 = arith.constant 0.00999999977 : f32
    %3 = vector.broadcast %cst_1 : f32 to vector<1x2048xf32>
    %4 = arith.mulf %0, %3 : vector<1x2048xf32>
    %5 = arith.select %2, %0, %4 : vector<1x2048xi1>, vector<1x2048xf32>
    %c0_2 = arith.constant 0 : index
    %c0_3 = arith.constant 0 : index
    %6 = vector.load %arg2[%c0_2, %c0_3] : memref<1x2048xf32, #tpu.memory_space<vmem>>, vector<1x2048xf32>
    tpu.vector_store %arg2[%c0_2, %c0_3], %5 {strides = array<i32>} : memref<1x2048xf32, #tpu.memory_space<vmem>>, vector<1x2048xf32>,
    return
  }
  func.func @transform_0(%arg0: i32) -> (i32, i32) {
    %c0_i32 = arith.constant 0 : i32
    %c0_i32_0 = arith.constant 0 : i32
    return %arg0, %c0_i32 : i32, i32
  }
  func.func @transform_1(%arg0: i32) -> (i32, i32) {
    %c0_i32 = arith.constant 0 : i32
    %c0_i32_0 = arith.constant 0 : i32
    return %arg0, %c0_i32 : i32, i32
  }
}

</mosaic_0001>

<bundles_post_ra>
// kernel: leaky_relu.1
= control target key start
LH: loop header
LB: loop body
LE: loop exit
PB: predicated region body
PF: predicated region fallthrough
CT: control target
= control target key end

     0   :  { %s44_s0 = inlined_call_operand.vmem [shape: f32[1,2048], index: 0, kind: input, shape index: {}]   ;;  %s45_s1 = inlined_call_operand.vmem [shape: f32[1,2048], index: 1, kind: output, shape index: {}]  }
   0x1   :  { %v8_v0 = vld [vmem:[%s44_s0] sm:$0xff]  ;;  %v9_v1 = vld [vmem:[%s44_s0 + $0x8] sm:$0xff] }
   0x2   :  { %vm10_vm0 = vcmp.ge.f32.partialorder %v8_v0, 0.0  ;;  %v12_v2 = vmul.f32 0.01, %v8_v0  ;;  %vm11_vm1 = vcmp.ge.f32.partialorder %v9_v1, 0.0  ;;  %v13_v3 = vmul.f32 0.01, %v9_v1 }
   0x4   :  { %v14_v4 = vsel %vm10_vm0, %v8_v0, %v12_v2  ;;  %v15_v5 = vsel %vm11_vm1, %v9_v1, %v13_v3 }
   0x5   :  { %16 = vst [vmem:[%s45_s1] sm:$0xff] %v14_v4 }
   0x6   :  { %17 = vst [vmem:[%s45_s1 + $0x8] sm:$0xff] %v15_v5 }

</bundles_post_ra>
